<compile_context>
chip_gen: v5e
topology: v5e:2x2
jax: 0.10.0
libtpu: 0.0.40
codegen_flags: <defaults>
</compile_context>

<pallas_src>
import functools

import jax
import jax.numpy as jnp
from jax.experimental import pallas as pl
from jax.experimental.pallas import tpu as pltpu


def _round_up(x, m):
    return ((x + m - 1) // m) * m


def _cdiv(a, b):
    return -(-a // b)


def _vmem_capacity_bytes():
    """Physical VMEM per TensorCore; conservative fallback = v7x (64 MiB)."""
    try:
        return int(pltpu.get_tpu_info().vmem_capacity_bytes)
    except Exception:  # interpret mode / older API — assume smallest generation
        return 64 * 1024 * 1024


def _resident_spec(shape, single_buffer):
    """Constant-index BlockSpec: block stays VMEM-resident across grid steps.

    When `single_buffer` is True we request 1-deep buffering so large resident
    weights don't pay the default 2x double-buffer VMEM cost (matters for big
    hidden sizes under v7x's 64 MiB VMEM).
    """
    idx = lambda i: (0, 0)
    if single_buffer:
        try:
            return pl.BlockSpec(shape, idx, pipeline_mode=pl.Buffered(1))
        except (TypeError, AttributeError):
            pass
    return pl.BlockSpec(shape, idx)


def _classifier_kernel(x_ref, w1_ref, b1_ref, w2_ref, b2_ref, w3_ref, b3_ref,
                       out_ref):
    """Fused 3-layer MLP forward on one (TILE_B, ...) batch tile."""
    # In-kernel cast: x streams from HBM as f32, MXU operand is bf16 (VPU cast
    # is free under MXU slack; saves a whole wrapper-side HBM pass).
    x = x_ref[...].astype(jnp.bfloat16)                       # (TILE_B, IN)

    # Layer 1: Linear -> (Dropout: identity) -> ReLU
    h1 = jnp.dot(x, w1_ref[...], preferred_element_type=jnp.float32)
    h1 = jnp.maximum(h1 + b1_ref[...], 0.0).astype(jnp.bfloat16)

    # Layer 2: Linear -> (Dropout: identity) -> ReLU
    h2 = jnp.dot(h1, w2_ref[...], preferred_element_type=jnp.float32)
    h2 = jnp.maximum(h2 + b2_ref[...], 0.0).astype(jnp.bfloat16)

    # Layer 3: Linear -> (Dropout: identity); lane-padded output columns.
    out = jnp.dot(h2, w3_ref[...], preferred_element_type=jnp.float32)
    out_ref[...] = (out + b3_ref[...]).astype(out_ref.dtype)


def prepare_params(params):
    """One-time layout/dtype prep (do NOT redo per forward call).

    - Weights cast to bf16 (MXU operands; accumulation stays f32 in-kernel).
    - w3/b3 lane-padded so the class dim is a multiple of 128 (unmasked vst).
    - Biases kept f32 (added in f32 after the matmul).
    """
    w3, b3 = params["w3"], params["b3"]
    num_classes = w3.shape[1]
    c_pad = _round_up(num_classes, 128)
    if c_pad != num_classes:
        w3 = jnp.pad(w3, ((0, 0), (0, c_pad - num_classes)))
        b3 = jnp.pad(b3, ((0, 0), (0, c_pad - num_classes)))
    return dict(
        w1=params["w1"].astype(jnp.bfloat16),
        b1=params["b1"].astype(jnp.float32),
        w2=params["w2"].astype(jnp.bfloat16),
        b2=params["b2"].astype(jnp.float32),
        w3=w3.astype(jnp.bfloat16),
        b3=b3.astype(jnp.float32),
    )


def classifier_forward(x, prepared, num_classes, *, tile_b=1024,
                       out_dtype=jnp.bfloat16):
    """x: (B, input_size) f32.  prepared: output of prepare_params()."""
    w1, b1 = prepared["w1"], prepared["b1"]
    w2, b2 = prepared["w2"], prepared["b2"]
    w3, b3 = prepared["w3"], prepared["b3"]

    B, input_size = x.shape
    H = w1.shape[1]
    c_pad = w3.shape[1]
    assert c_pad % 128 == 0, "call prepare_params() before classifier_forward()"

    vmem_cap = int(0.75 * _vmem_capacity_bytes())

    # ---- batch tile selection -----------------------------------------------
    # Small B: a single grid step with <= 15 padded rows (round to 16 for bf16
    # sublane packing).  Large B: big tiles to amortize the ~0.35 us/step fixed
    # cost, with an even step count so the v7x megacore splits the batch.
    if B <= tile_b:
        tile_b = _round_up(max(B, 16), 16)
        n_steps = 1
    else:
        tile_b = _round_up(tile_b, 16)
        n_steps = _cdiv(B, tile_b)
        if n_steps % 2 == 1:
            n_steps += 1
            tile_b = _round_up(_cdiv(B, n_steps), 16)

    def footprint(tb):
        return (2 * tb * input_size * 4                      # x tiles (f32, 2 bufs)
                + 2 * tb * c_pad * 2                         # out tiles (bf16, 2 bufs)
                + 2 * (input_size * H + H * H + H * c_pad) * 2   # weights (bf16)
                + 2 * (2 * H + c_pad) * 4                    # biases (f32)
                + 4 * tb * H * 4)                            # h1/h2 live values

    while tile_b > 16 and footprint(tile_b) > vmem_cap:
        tile_b = _round_up(tile_b // 2, 16)
        n_steps = _cdiv(B, tile_b)

    b_pad = n_steps * tile_b
    if b_pad != B:
        x = jnp.pad(x, ((0, b_pad - B), (0, 0)))

    # Single-buffer the resident weights only when they are big enough for the
    # 2x default buffering to matter (keeps the small-config path maximally
    # conservative).
    weight_bytes = (input_size * H + H * H + H * c_pad) * 2
    single_buf = weight_bytes > (2 * 1024 * 1024)

    in_specs = [
        pl.BlockSpec((tile_b, input_size), lambda i: (i, 0)),   # x tile (streamed)
        _resident_spec((input_size, H), single_buf),            # w1
        _resident_spec((1, H), single_buf),                      # b1
        _resident_spec((H, H), single_buf),                      # w2
        _resident_spec((1, H), single_buf),                      # b2
        _resident_spec((H, c_pad), single_buf),                  # w3 (lane padded)
        _resident_spec((1, c_pad), single_buf),                  # b3 (lane padded)
    ]
    out_spec = pl.BlockSpec((tile_b, c_pad), lambda i: (i, 0))

    vmem_limit = int(min(vmem_cap,
                         max(32 * 1024 * 1024, 2 * footprint(tile_b))))

    cost = pl.CostEstimate(
        flops=2 * b_pad * (input_size * H + H * H + H * c_pad),
        transcendentals=0,
        bytes_accessed=int(
            b_pad * input_size * 4                                # x read (f32)
            + (w1.size + w2.size + w3.size) * 2                   # weights (bf16)
            + (b1.size + b2.size + b3.size) * 4                   # biases (f32)
            + b_pad * c_pad * 2),                                 # out write (bf16)
    )

    out_padded = pl.pallas_call(
        _classifier_kernel,
        out_shape=jax.ShapeDtypeStruct((b_pad, c_pad), out_dtype),
        grid=(n_steps,),
        in_specs=in_specs,
        out_specs=out_spec,
        compiler_params=pltpu.CompilerParams(
            dimension_semantics=("parallel",),   # megacore sharding on v7x
            vmem_limit_bytes=vmem_limit,
        ),
        cost_estimate=cost,
    )(x, w1, b1, w2, b2, w3, b3)

    return out_padded[:B, :num_classes]


def init_params(key, input_size, hidden_size, num_classes):
    """Deterministic init mirroring nn.Linear shapes (stored transposed)."""
    ks = jax.random.split(key, 6)

    def linear(kw, kb, fan_in, fan_out):
        bound = 1.0 / jnp.sqrt(fan_in)
        w = jax.random.uniform(kw, (fan_in, fan_out), jnp.float32, -bound, bound)
        b = jax.random.uniform(kb, (1, fan_out), jnp.float32, -bound, bound)
        return w, b

    w1, b1 = linear(ks[0], ks[1], input_size, hidden_size)
    w2, b2 = linear(ks[2], ks[3], hidden_size, hidden_size)
    w3, b3 = linear(ks[4], ks[5], hidden_size, num_classes)
    return dict(w1=w1, b1=b1, w2=w2, b2=b2, w3=w3, b3=b3)


def _reference(x, params):
    """Pure-JAX reference with the same bf16-operand / f32-accumulate recipe."""
    xb = x.astype(jnp.bfloat16)
    w1b = params["w1"].astype(jnp.bfloat16)
    w2b = params["w2"].astype(jnp.bfloat16)
    w3b = params["w3"].astype(jnp.bfloat16)
    h1 = jnp.maximum(
        jnp.dot(xb, w1b, preferred_element_type=jnp.float32) + params["b1"], 0.0
    ).astype(jnp.bfloat16)
    h2 = jnp.maximum(
        jnp.dot(h1, w2b, preferred_element_type=jnp.float32) + params["b2"], 0.0
    ).astype(jnp.bfloat16)
    return jnp.dot(h2, w3b, preferred_element_type=jnp.float32) + params["b3"]


if __name__ == "__main__":
    input_size, hidden_size, num_classes = 64, 128, 10
    batch = 200  # not a multiple of 16/128 -> exercises padding + single-step path

    key = jax.random.PRNGKey(0)
    k_x, k_p = jax.random.split(key)

    x = jax.random.normal(k_x, (batch, input_size), dtype=jnp.float32)
    params = init_params(k_p, input_size, hidden_size, num_classes)
    prepared = prepare_params(params)   # one-time bf16 cast + lane padding

    fwd = jax.jit(functools.partial(classifier_forward, num_classes=num_classes))
    out = jax.block_until_ready(fwd(x, prepared))

    ref = _reference(x, params)
    assert out.shape == (batch, num_classes), out.shape
    # Kernel emits bf16 logits; compare against the bf16-rounded f32 reference.
    out_f32 = out.astype(jnp.float32)
    ref_bf16 = ref.astype(jnp.bfloat16).astype(jnp.float32)
    assert jnp.allclose(out_f32, ref_bf16, atol=2e-2, rtol=2e-2), (
        float(jnp.max(jnp.abs(out_f32 - ref_bf16))))

    print("KERNEL_OK")
</pallas_src>

<mosaic_0001>
module attributes {stable_mosaic.version = 11 : i64} {
  func.func @_classifier_kernel(%arg0: i32, %arg1: memref<208x64xf32, #tpu.memory_space<vmem>>, %arg2: memref<64x128xbf16, #tpu.memory_space<vmem>>, %arg3: memref<1x128xf32, #tpu.memory_space<vmem>>, %arg4: memref<128x128xbf16, #tpu.memory_space<vmem>>, %arg5: memref<1x128xf32, #tpu.memory_space<vmem>>, %arg6: memref<128x128xbf16, #tpu.memory_space<vmem>>, %arg7: memref<1x128xf32, #tpu.memory_space<vmem>>, %arg8: memref<208x128xbf16, #tpu.memory_space<vmem>>) attributes {dimension_semantics = [#tpu.dimension_semantics<parallel>], iteration_bounds = array<i64: 1>, scalar_prefetch = 0 : i64, scratch_operands = 0 : i64, tpu.core_type = #tpu.core_type<tc>, window_params = [{transform_indices = @transform_0, window_bounds = array<i64: 208, 64>}, {pipeline_mode = #tpu.pipeline_mode<synchronous>, transform_indices = @transform_1, window_bounds = array<i64: 64, 128>}, {pipeline_mode = #tpu.pipeline_mode<synchronous>, transform_indices = @transform_2, window_bounds = array<i64: 1, 128>}, {pipeline_mode = #tpu.pipeline_mode<synchronous>, transform_indices = @transform_3, window_bounds = array<i64: 128, 128>}, {pipeline_mode = #tpu.pipeline_mode<synchronous>, transform_indices = @transform_4, window_bounds = array<i64: 1, 128>}, {pipeline_mode = #tpu.pipeline_mode<synchronous>, transform_indices = @transform_5, window_bounds = array<i64: 128, 128>}, {pipeline_mode = #tpu.pipeline_mode<synchronous>, transform_indices = @transform_6, window_bounds = array<i64: 1, 128>}, {transform_indices = @transform_7, window_bounds = array<i64: 208, 128>}]} {
    %c0 = arith.constant 0 : index
    %c0_0 = arith.constant 0 : index
    %0 = vector.load %arg1[%c0, %c0_0] : memref<208x64xf32, #tpu.memory_space<vmem>>, vector<208x64xf32>
    %1 = arith.truncf %0 : vector<208x64xf32> to vector<208x64xbf16>
    %c0_1 = arith.constant 0 : index
    %c0_2 = arith.constant 0 : index
    %2 = vector.load %arg2[%c0_1, %c0_2] : memref<64x128xbf16, #tpu.memory_space<vmem>>, vector<64x128xbf16>
    %cst = arith.constant dense<0.000000e+00> : vector<208x128xf32>
    %3 = tpu.matmul %1, %2, %cst {dimension_numbers = #tpu.dot_dimension_numbers<[1], [0], [0], [1], [0, 0, 1, 1], [], []>} : vector<208x64xbf16>, vector<64x128xbf16>, vector<208x128xf32> -> vector<208x128xf32>
    %c0_3 = arith.constant 0 : index
    %c0_4 = arith.constant 0 : index
    %4 = vector.load %arg3[%c0_3, %c0_4] : memref<1x128xf32, #tpu.memory_space<vmem>>, vector<1x128xf32>
    %5 = vector.broadcast %4 : vector<1x128xf32> to vector<208x128xf32>
    %6 = arith.addf %3, %5 : vector<208x128xf32>
    %cst_5 = arith.constant 0.000000e+00 : f32
    %7 = vector.broadcast %cst_5 : f32 to vector<208x128xf32>
    %8 = arith.maximumf %6, %7 : vector<208x128xf32>
    %9 = arith.truncf %8 : vector<208x128xf32> to vector<208x128xbf16>
    %c0_6 = arith.constant 0 : index
    %c0_7 = arith.constant 0 : index
    %10 = vector.load %arg4[%c0_6, %c0_7] : memref<128x128xbf16, #tpu.memory_space<vmem>>, vector<128x128xbf16>
    %cst_8 = arith.constant dense<0.000000e+00> : vector<208x128xf32>
    %11 = tpu.matmul %9, %10, %cst_8 {dimension_numbers = #tpu.dot_dimension_numbers<[1], [0], [0], [1], [0, 0, 1, 1], [], []>} : vector<208x128xbf16>, vector<128x128xbf16>, vector<208x128xf32> -> vector<208x128xf32>
    %c0_9 = arith.constant 0 : index
    %c0_10 = arith.constant 0 : index
    %12 = vector.load %arg5[%c0_9, %c0_10] : memref<1x128xf32, #tpu.memory_space<vmem>>, vector<1x128xf32>
    %13 = vector.broadcast %12 : vector<1x128xf32> to vector<208x128xf32>
    %14 = arith.addf %11, %13 : vector<208x128xf32>
    %cst_11 = arith.constant 0.000000e+00 : f32
    %15 = vector.broadcast %cst_11 : f32 to vector<208x128xf32>
    %16 = arith.maximumf %14, %15 : vector<208x128xf32>
    %17 = arith.truncf %16 : vector<208x128xf32> to vector<208x128xbf16>
    %c0_12 = arith.constant 0 : index
    %c0_13 = arith.constant 0 : index
    %18 = vector.load %arg6[%c0_12, %c0_13] : memref<128x128xbf16, #tpu.memory_space<vmem>>, vector<128x128xbf16>
    %cst_14 = arith.constant dense<0.000000e+00> : vector<208x128xf32>
    %19 = tpu.matmul %17, %18, %cst_14 {dimension_numbers = #tpu.dot_dimension_numbers<[1], [0], [0], [1], [0, 0, 1, 1], [], []>} : vector<208x128xbf16>, vector<128x128xbf16>, vector<208x128xf32> -> vector<208x128xf32>
    %c0_15 = arith.constant 0 : index
    %c0_16 = arith.constant 0 : index
    %20 = vector.load %arg7[%c0_15, %c0_16] : memref<1x128xf32, #tpu.memory_space<vmem>>, vector<1x128xf32>
    %21 = vector.broadcast %20 : vector<1x128xf32> to vector<208x128xf32>
    %22 = arith.addf %19, %21 : vector<208x128xf32>
    %23 = arith.truncf %22 : vector<208x128xf32> to vector<208x128xbf16>
    %c0_17 = arith.constant 0 : index
    %c0_18 = arith.constant 0 : index
    %24 = vector.load %arg8[%c0_17, %c0_18] : memref<208x128xbf16, #tpu.memory_space<vmem>>, vector<208x128xbf16>
    tpu.vector_store %arg8[%c0_17, %c0_18], %23 {strides = array<i32>} : memref<208x128xbf16, #tpu.memory_space<vmem>>, vector<208x128xbf16>,
    return
  }
  func.func @transform_0(%arg0: i32) -> (i32, i32) {
    %c0_i32 = arith.constant 0 : i32
    %c0_i32_0 = arith.constant 0 : i32
    return %arg0, %c0_i32 : i32, i32
  }
  func.func @transform_1(%arg0: i32) -> (i32, i32) {
    %c0_i32 = arith.constant 0 : i32
    %c0_i32_0 = arith.constant 0 : i32
    %c0_i32_1 = arith.constant 0 : i32
    return %c0_i32, %c0_i32_0 : i32, i32
  }
  func.func @transform_2(%arg0: i32) -> (i32, i32) {
    %c0_i32 = arith.constant 0 : i32
    %c0_i32_0 = arith.constant 0 : i32
    %c0_i32_1 = arith.constant 0 : i32
    return %c0_i32, %c0_i32_0 : i32, i32
  }
  func.func @transform_3(%arg0: i32) -> (i32, i32) {
    %c0_i32 = arith.constant 0 : i32
    %c0_i32_0 = arith.constant 0 : i32
    %c0_i32_1 = arith.constant 0 : i32
    return %c0_i32, %c0_i32_0 : i32, i32
  }
  func.func @transform_4(%arg0: i32) -> (i32, i32) {
    %c0_i32 = arith.constant 0 : i32
    %c0_i32_0 = arith.constant 0 : i32
    %c0_i32_1 = arith.constant 0 : i32
    return %c0_i32, %c0_i32_0 : i32, i32
  }
  func.func @transform_5(%arg0: i32) -> (i32, i32) {
    %c0_i32 = arith.constant 0 : i32
    %c0_i32_0 = arith.constant 0 : i32
    %c0_i32_1 = arith.constant 0 : i32
    return %c0_i32, %c0_i32_0 : i32, i32
  }
  func.func @transform_6(%arg0: i32) -> (i32, i32) {
    %c0_i32 = arith.constant 0 : i32
    %c0_i32_0 = arith.constant 0 : i32
    %c0_i32_1 = arith.constant 0 : i32
    return %c0_i32, %c0_i32_0 : i32, i32
  }
  func.func @transform_7(%arg0: i32) -> (i32, i32) {
    %c0_i32 = arith.constant 0 : i32
    %c0_i32_0 = arith.constant 0 : i32
    return %arg0, %c0_i32 : i32, i32
  }
}

</mosaic_0001>

<bundles_post_ra>
// kernel: classifier_forward.1
= control target key start
LH: loop header
LB: loop body
LE: loop exit
PB: predicated region body
PF: predicated region fallthrough
CT: control target
= control target key end

     0   :  { %vm102_vm0 = vcmask 523264   ;;  %s1170_s1 = inlined_call_operand.vmem [shape: bf16[64,128], index: 1, kind: input, shape index: {}]   ;;  %s1171_s2 = inlined_call_operand.vmem [shape: f32[1,128], index: 2, kind: input, shape index: {}]   ;;  %s1172_s0 = inlined_call_operand.vmem [shape: f32[208,64], index: 0, kind: input, shape index: {}]   ;;  %s1173_s3 = inlined_call_operand.vmem [shape: bf16[128,128], index: 3, kind: input, shape index: {}]   ;;  %s1174_s4 = inlined_call_operand.vmem [shape: f32[1,128], index: 4, kind: input, shape index: {}]   ;;  %s1175_s5 = inlined_call_operand.vmem [shape: bf16[128,128], index: 5, kind: input, shape index: {}]   ;;  %s1176_s6 = inlined_call_operand.vmem [shape: f32[1,128], index: 6, kind: input, shape index: {}]   ;;  %s1177_s7 = inlined_call_operand.vmem [shape: bf16[208,128], index: 7, kind: output, shape index: {}]  }
   0x1   :  { %v730_v0 = vld [vmem:[%s1170_s1 + $0x18] sm:$0xff]  ;;  %v729_v1 = vld [vmem:[%s1170_s1 + $0x10] sm:$0xff]  ;;  %v728_v2 = vld [vmem:[%s1170_s1 + $0x8] sm:$0xff] }
   0x2   :  { %146 = vmatpush.bf16.msra.mxu0 %v730_v0  ;;  %824 = vmatpush.bf16.msra.mxu3 %v730_v0  ;;  %v727_v3 = vld [vmem:[%s1170_s1] sm:$0xff]  ;;  %v28_v5 = vld [vmem:[%s1172_s0 + $0x8] sm:$0xff]  ;;  %v29_v7 = vld [vmem:[%s1172_s0 + $0x10] sm:$0xff] }
   0x3   :  { %v27_v4 = vld [vmem:[%s1172_s0] sm:$0xff]  ;;  %v30_v8 = vld [vmem:[%s1172_s0 + $0x18] sm:$0xff]  ;;  %v32_v11 = vld [vmem:[%s1172_s0 + $0x28] sm:$0xff] }
   0x4   :  { %v53_v6 = vpack.c.bf16 %v28_v5, %v27_v4  ;;  %v54_v9 = vpack.c.bf16 %v30_v8, %v29_v7  ;;  %v31_v10 = vld [vmem:[%s1172_s0 + $0x20] sm:$0xff]  ;;  %v33_v13 = vld [vmem:[%s1172_s0 + $0x30] sm:$0xff]  ;;  %v34_v14 = vld [vmem:[%s1172_s0 + $0x38] sm:$0xff] }
   0x5   :  { %v55_v12 = vpack.c.bf16 %v32_v11, %v31_v10  ;;  %v56_v15 = vpack.c.bf16 %v34_v14, %v33_v13  ;;  %v35_v16 = vld [vmem:[%s1172_s0 + $0x40] sm:$0xff]  ;;  %v36_v17 = vld [vmem:[%s1172_s0 + $0x48] sm:$0xff]  ;;  %v738_v19 = vld [vmem:[%s1173_s3 + $0x38] sm:$0xff] }
   0x6   :  { %147 = vmatpush.bf16.msra.mxu0 %v729_v1  ;;  %825 = vmatpush.bf16.msra.mxu3 %v729_v1  ;;  %v57_v18 = vpack.c.bf16 %v36_v17, %v35_v16  ;;  %v37_v20 = vld [vmem:[%s1172_s0 + $0x50] sm:$0xff]  ;;  %v38_v21 = vld [vmem:[%s1172_s0 + $0x58] sm:$0xff]  ;;  %v736_v24 = vld [vmem:[%s1173_s3 + $0x28] sm:$0xff] }
   0x7   :  { %323 = vmatpush.bf16.msra.mxu1 %v738_v19  ;;  %v58_v22 = vpack.c.bf16 %v38_v21, %v37_v20  ;;  %v737_v23 = vld [vmem:[%s1173_s3 + $0x30] sm:$0xff]  ;;  %v735_v25 = vld [vmem:[%s1173_s3 + $0x20] sm:$0xff]  ;;  %v40_v27 = vld [vmem:[%s1172_s0 + $0x68] sm:$0xff] }
   0x8   :  { %v39_v26 = vld [vmem:[%s1172_s0 + $0x60] sm:$0xff]  ;;  %v734_v28 = vld [vmem:[%s1173_s3 + $0x18] sm:$0xff]  ;;  %v733_v30 = vld [vmem:[%s1173_s3 + $0x10] sm:$0xff] }
   0x9   :  { %v59_v29 = vpack.c.bf16 %v40_v27, %v39_v26  ;;  %v732_v31 = vld [vmem:[%s1173_s3 + $0x8] sm:$0xff]  ;;  %v731_v32 = vld [vmem:[%s1173_s3] sm:$0xff]  ;;  %v41_v33 = vld [vmem:[%s1172_s0 + $0x70] sm:$0xff] }
   0xa   :  { %148 = vmatpush.bf16.msra.mxu0 %v728_v2  ;;  %826 = vmatpush.bf16.msra.mxu3 %v728_v2  ;;  %v42_v34 = vld [vmem:[%s1172_s0 + $0x78] sm:$0xff]  ;;  %v43_v36 = vld [vmem:[%s1172_s0 + $0x80] sm:$0xff]  ;;  %v44_v37 = vld [vmem:[%s1172_s0 + $0x88] sm:$0xff] }
   0xb   :  { %324 = vmatpush.bf16.msra.mxu1 %v737_v23  ;;  %v60_v35 = vpack.c.bf16 %v42_v34, %v41_v33  ;;  %v61_v38 = vpack.c.bf16 %v44_v37, %v43_v36  ;;  %v49_v40 = vld [vmem:[%s1172_s0 + $0xb0] sm:$0xff]  ;;  %v50_v41 = vld [vmem:[%s1172_s0 + $0xb8] sm:$0xff]  ;;  %v994_v42 = vld [vmem:[%s1171_s2] ss:$0 sm:$0xff] }
   0xc   :  { %v64_v43 = vpack.c.bf16 %v50_v41, %v49_v40  ;;  %v45_v49 = vld [vmem:[%s1172_s0 + $0x90] sm:$0xff]  ;;  %v46_v50 = vld [vmem:[%s1172_s0 + $0x98] sm:$0xff]  ;;  %v51_v54 = vld [vmem:[%s1172_s0 + $0xc0] sm:$0xff] }
   0xd   :  { %v62_v52 = vpack.c.bf16 %v46_v50, %v45_v49  ;;  %v52_v55 = vld [vmem:[%s1172_s0 + $0xc8] sm:$0xff]  ;;  %v47_v62 = vld [vmem:[%s1172_s0 + $0xa0] sm:$0xff]  ;;  %v746_v27 = vld [vmem:[%s1175_s5 + $0x38] sm:$0xff] }
   0xe   :  { %149 = vmatpush.bf16.msra.mxu0 %v727_v3  ;;  %827 = vmatpush.bf16.msra.mxu3 %v727_v3  ;;  %v65_v56 = vpack.c.bf16 %v52_v55, %v51_v54  ;;  %v48_v63 = vld [vmem:[%s1172_s0 + $0xa8] sm:$0xff]  ;;  %v743_v34 = vld [vmem:[%s1175_s5 + $0x20] sm:$0xff] }
   0xf   :  { %325 = vmatpush.bf16.msra.mxu1 %v736_v24  ;;  %v63_v1 = vpack.c.bf16 %v48_v63, %v47_v62  ;;  %504 = vmatpush.bf16.msra.mxu2 %v746_v27  ;;  %v744_v33 = vld [vmem:[%s1175_s5 + $0x28] sm:$0xff] }
  0x11   :  { %650 = vmatmul.msk.bf16.vlgmr.msra.gmra.mxu0 %vm102_vm0, %v53_v6  ;;  %661 = vmatmul.msk.bf16.vlgmr.msra.gmra.mxu3 %vm102_vm0, %v64_v43  ;;  %v741_v43 = vld [vmem:[%s1175_s5 + $0x10] sm:$0xff] }
  0x12   :  { %828 = vmatpush.bf16.msrb.mxu3 %v738_v19 }
  0x13   :  { %326 = vmatpush.bf16.msra.mxu1 %v735_v25 }
  0x16   :  { %829 = vmatpush.bf16.msrb.mxu3 %v737_v23 }
  0x17   :  { %327 = vmatpush.bf16.msra.mxu1 %v734_v28 }
  0x1a   :  { %830 = vmatpush.bf16.msrb.mxu3 %v736_v24 }
  0x1b   :  { %328 = vmatpush.bf16.msra.mxu1 %v733_v30 }
  0x1e   :  { %831 = vmatpush.bf16.msrb.mxu3 %v735_v25 }
  0x1f   :  { %329 = vmatpush.bf16.msra.mxu1 %v732_v31 }
  0x21   :  { %651 = vmatmul.msk.bf16.gmra.mxu0 %vm102_vm0, %v54_v9  ;;  %662 = vmatmul.msk.bf16.gmra.mxu3 %vm102_vm0, %v65_v56 }
  0x22   :  { %832 = vmatpush.bf16.msrb.mxu3 %v734_v28 }
  0x23   :  { %330 = vmatpush.bf16.msra.mxu1 %v731_v32 }
  0x26   :  { %833 = vmatpush.bf16.msrb.mxu3 %v733_v30 }
  0x2a   :  { %834 = vmatpush.bf16.msrb.mxu3 %v732_v31  ;;  %v745_v31 = vld [vmem:[%s1175_s5 + $0x30] sm:$0xff] }
  0x2b   :  { %505 = vmatpush.bf16.msra.mxu2 %v745_v31 }
  0x2e   :  { %835 = vmatpush.bf16.msrb.mxu3 %v731_v32 }
  0x2f   :  { %506 = vmatpush.bf16.msra.mxu2 %v744_v33 }
  0x31   :  { %652 = vmatmul.msk.bf16.gmra.mxu0 %vm102_vm0, %v55_v12 }
  0x32   :  { %836 = vmatpush.bf16.msra.mxu3 %v746_v27 }
  0x33   :  { %507 = vmatpush.bf16.msra.mxu2 %v743_v34 }
  0x36   :  { %837 = vmatpush.bf16.msra.mxu3 %v745_v31 }
  0x3a   :  { %838 = vmatpush.bf16.msra.mxu3 %v744_v33 }
  0x3e   :  { %839 = vmatpush.bf16.msra.mxu3 %v743_v34 }
  0x41   :  { %653 = vmatmul.msk.bf16.gmra.mxu0 %vm102_vm0, %v56_v15 }
  0x51   :  { %654 = vmatmul.msk.bf16.gmra.mxu0 %vm102_vm0, %v57_v18 }
  0x61   :  { %655 = vmatmul.msk.bf16.gmra.mxu0 %vm102_vm0, %v58_v22 }
  0x71   :  { %656 = vmatmul.msk.bf16.gmra.mxu0 %vm102_vm0, %v59_v29 }
  0x81   :  { %657 = vmatmul.msk.bf16.gmra.mxu0 %vm102_vm0, %v60_v35 }
  0x8e   :  { %v151_v39 = vpop.f32.mrf.mxu0 }
  0x8f   :  { %v152_v44 = vadd.f32 %v994_v42, %v151_v39 }
  0x91   :  { %658 = vmatmul.msk.bf16.gmra.mxu0 %vm102_vm0, %v61_v38  ;;  %v216_v47 = vmax.f32 %v152_v44, 0.0  ;;  %v742_v38 = vld [vmem:[%s1175_s5 + $0x18] sm:$0xff] }
  0x92   :  { %508 = vmatpush.bf16.msra.mxu2 %v742_v38  ;;  %840 = vmatpush.bf16.msra.mxu3 %v742_v38 }
  0x96   :  { %v153_v45 = vpop.f32.mrf.mxu0  ;;  %509 = vmatpush.bf16.msra.mxu2 %v741_v43  ;;  %841 = vmatpush.bf16.msra.mxu3 %v741_v43 }
  0x97   :  { %v154_v46 = vadd.f32 %v994_v42, %v153_v45  ;;  %v740_v45 = vld [vmem:[%s1175_s5 + $0x8] sm:$0xff] }
  0x99   :  { %v217_v48 = vmax.f32 %v154_v46, 0.0  ;;  %v739_v46 = vld [vmem:[%s1175_s5] sm:$0xff] }
  0x9a   :  { %510 = vmatpush.bf16.msra.mxu2 %v740_v45  ;;  %842 = vmatpush.bf16.msra.mxu3 %v740_v45 }
  0x9b   :  { %v242_v51 = vpack.c.bf16 %v217_v48, %v216_v47 }
  0x9d   :  { %331 = vmatmul.bf16.vlgmr.msra.gmra.mxu1 %v242_v51 }
  0x9e   :  { %v156_v53 = vpop.f32.mrf.mxu0  ;;  %511 = vmatpush.bf16.msra.mxu2 %v739_v46  ;;  %843 = vmatpush.bf16.msra.mxu3 %v739_v46 }
  0x9f   :  { %v157_v57 = vadd.f32 %v994_v42, %v156_v53 }
  0xa1   :  { %659 = vmatmul.msk.bf16.gmra.mxu0 %vm102_vm0, %v62_v52  ;;  %v218_v60 = vmax.f32 %v157_v57, 0.0 }
  0xa6   :  { %v158_v58 = vpop.f32.mrf.mxu0 }
  0xa7   :  { %v159_v59 = vadd.f32 %v994_v42, %v158_v58 }
  0xa9   :  { %v219_v61 = vmax.f32 %v159_v59, 0.0 }
  0xab   :  { %v243_v0 = vpack.c.bf16 %v219_v61, %v218_v60  ;;  %v1064_v61 = vld [vmem:[%s1174_s4] ss:$0 sm:$0xff] }
  0xad   :  { %336 = vmatmul.bf16.gmra.mxu1 %v243_v0 }
  0xae   :  { %v161_v2 = vpop.f32.mrf.mxu0 }
  0xaf   :  { %v162_v3 = vadd.f32 %v994_v42, %v161_v2 }
  0xb1   :  { %660 = vmatmul.msk.bf16.gmra.mxu0 %vm102_vm0, %v63_v1  ;;  %v220_v6 = vmax.f32 %v162_v3, 0.0 }
  0xb6   :  { %v163_v4 = vpop.f32.mrf.mxu0 }
  0xb7   :  { %v164_v5 = vadd.f32 %v994_v42, %v163_v4 }
  0xb9   :  { %v221_v7 = vmax.f32 %v164_v5, 0.0 }
  0xbb   :  { %v244_v8 = vpack.c.bf16 %v221_v7, %v220_v6 }
  0xbd   :  { %341 = vmatmul.bf16.gmra.mxu1 %v244_v8 }
  0xbe   :  { %v166_v9 = vpop.f32.mrf.mxu0 }
  0xbf   :  { %v167_v10 = vadd.f32 %v994_v42, %v166_v9 }
  0xc1   :  { %v222_v13 = vmax.f32 %v167_v10, 0.0 }
  0xc6   :  { %v168_v11 = vpop.f32.mrf.mxu0 }
  0xc7   :  { %v169_v12 = vadd.f32 %v994_v42, %v168_v11 }
  0xc9   :  { %v223_v14 = vmax.f32 %v169_v12, 0.0 }
  0xcb   :  { %v245_v15 = vpack.c.bf16 %v223_v14, %v222_v13 }
  0xcd   :  { %346 = vmatmul.bf16.gmra.mxu1 %v245_v15  ;;  %v206_v15 = vpop.f32.mrf.mxu3 }
  0xce   :  { %v171_v16 = vpop.f32.mrf.mxu0 }
  0xcf   :  { %v172_v17 = vadd.f32 %v994_v42, %v171_v16 }
  0xd1   :  { %v224_v20 = vmax.f32 %v172_v17, 0.0 }
  0xd5   :  { %v208_v27 = vpop.f32.mrf.mxu3 }
  0xd6   :  { %v173_v18 = vpop.f32.mrf.mxu0  ;;  %v209_v31 = vadd.f32 %v994_v42, %v208_v27 }
  0xd7   :  { %v174_v19 = vadd.f32 %v994_v42, %v173_v18 }
  0xd9   :  { %v225_v21 = vmax.f32 %v174_v19, 0.0 }
  0xdb   :  { %v246_v22 = vpack.c.bf16 %v225_v21, %v224_v20 }
  0xdd   :  { %351 = vmatmul.bf16.gmra.mxu1 %v246_v22 }
  0xde   :  { %v176_v23 = vpop.f32.mrf.mxu0 }
  0xdf   :  { %v177_v24 = vadd.f32 %v994_v42, %v176_v23 }
  0xe1   :  { %v226_v28 = vmax.f32 %v177_v24, 0.0 }
  0xe6   :  { %v178_v25 = vpop.f32.mrf.mxu0 }
  0xe7   :  { %v179_v26 = vadd.f32 %v994_v42, %v178_v25 }
  0xe9   :  { %v227_v29 = vmax.f32 %v179_v26, 0.0 }
  0xeb   :  { %v247_v30 = vpack.c.bf16 %v227_v29, %v226_v28 }
  0xed   :  { %356 = vmatmul.bf16.gmra.mxu1 %v247_v30  ;;  %v207_v30 = vadd.f32 %v994_v42, %v206_v15 }
  0xee   :  { %v181_v32 = vpop.f32.mrf.mxu0 }
  0xef   :  { %v182_v35 = vadd.f32 %v994_v42, %v181_v32 }
  0xf1   :  { %v228_v39 = vmax.f32 %v182_v35, 0.0  ;;  %v211_v35 = vpop.f32.mrf.mxu3 }
  0xf2   :  { %v212_v45 = vadd.f32 %v994_v42, %v211_v35 }
  0xf6   :  { %v183_v36 = vpop.f32.mrf.mxu0 }
  0xf7   :  { %v184_v37 = vadd.f32 %v994_v42, %v183_v36  ;;  %v238_v36 = vmax.f32 %v207_v30, 0.0 }
  0xf9   :  { %v229_v40 = vmax.f32 %v184_v37, 0.0  ;;  %v239_v37 = vmax.f32 %v209_v31, 0.0 }
  0xfb   :  { %v248_v41 = vpack.c.bf16 %v229_v40, %v228_v39  ;;  %v253_v40 = vpack.c.bf16 %v239_v37, %v238_v36 }
  0xfd   :  { %361 = vmatmul.bf16.gmra.mxu1 %v248_v41  ;;  %v213_v41 = vpop.f32.mrf.mxu3 }
  0xfe   :  { %v186_v44 = vpop.f32.mrf.mxu0  ;;  %v214_v46 = vadd.f32 %v994_v42, %v213_v41 }
  0xff   :  { %v187_v47 = vadd.f32 %v994_v42, %v186_v44 }
 0x101   :  { %v230_v50 = vmax.f32 %v187_v47, 0.0 }
 0x106   :  { %v188_v48 = vpop.f32.mrf.mxu0 }
 0x107   :  { %v189_v49 = vadd.f32 %v994_v42, %v188_v48 }
 0x109   :  { %v231_v51 = vmax.f32 %v189_v49, 0.0 }
 0x10b   :  { %v249_v52 = vpack.c.bf16 %v231_v51, %v230_v50  ;;  %v240_v50 = vmax.f32 %v212_v45, 0.0  ;;  %v241_v51 = vmax.f32 %v214_v46, 0.0 }
 0x10d   :  { %366 = vmatmul.bf16.gmra.mxu1 %v249_v52 }
 0x10e   :  { %v191_v53 = vpop.f32.mrf.mxu0 }
 0x10f   :  { %v192_v54 = vadd.f32 %v994_v42, %v191_v53 }
 0x111   :  { %v232_v57 = vmax.f32 %v192_v54, 0.0  ;;  %v254_v54 = vpack.c.bf16 %v241_v51, %v240_v50 }
 0x116   :  { %v193_v55 = vpop.f32.mrf.mxu0 }
 0x117   :  { %v194_v56 = vadd.f32 %v994_v42, %v193_v55 }
 0x119   :  { %v233_v58 = vmax.f32 %v194_v56, 0.0 }
 0x11a   :  { %v332_v59 = vpop.f32.mrf.mxu1 }
 0x11b   :  { %v250_v60 = vpack.c.bf16 %v233_v58, %v232_v57  ;;  %v333_v63 = vadd.f32 %v1064_v61, %v332_v59 }
 0x11d   :  { %371 = vmatmul.bf16.gmra.mxu1 %v250_v60  ;;  %v397_v2 = vmax.f32 %v333_v63, 0.0 }
 0x11e   :  { %v196_v62 = vpop.f32.mrf.mxu0 }
 0x11f   :  { %v197_v3 = vadd.f32 %v994_v42, %v196_v62 }
 0x121   :  { %v234_v8 = vmax.f32 %v197_v3, 0.0 }
 0x122   :  { %v334_v0 = vpop.f32.mrf.mxu1 }
 0x123   :  { %v335_v1 = vadd.f32 %v1064_v61, %v334_v0 }
 0x125   :  { %v398_v4 = vmax.f32 %v335_v1, 0.0 }
 0x126   :  { %v198_v5 = vpop.f32.mrf.mxu0 }
 0x127   :  { %v199_v6 = vadd.f32 %v994_v42, %v198_v5  ;;  %v423_v7 = vpack.c.bf16 %v398_v4, %v397_v2 }
 0x129   :  { %v235_v9 = vmax.f32 %v199_v6, 0.0  ;;  %512 = vmatmul.bf16.vlgmr.msra.gmra.mxu2 %v423_v7 }
 0x12a   :  { %v337_v10 = vpop.f32.mrf.mxu1 }
 0x12b   :  { %v251_v11 = vpack.c.bf16 %v235_v9, %v234_v8  ;;  %v338_v13 = vadd.f32 %v1064_v61, %v337_v10 }
 0x12d   :  { %376 = vmatmul.bf16.gmra.mxu1 %v251_v11  ;;  %v399_v17 = vmax.f32 %v338_v13, 0.0 }
 0x12e   :  { %v201_v12 = vpop.f32.mrf.mxu0 }
 0x12f   :  { %v202_v18 = vadd.f32 %v994_v42, %v201_v12 }
 0x131   :  { %v236_v23 = vmax.f32 %v202_v18, 0.0 }
 0x132   :  { %v339_v14 = vpop.f32.mrf.mxu1 }
 0x133   :  { %v340_v16 = vadd.f32 %v1064_v61, %v339_v14 }
 0x135   :  { %v400_v19 = vmax.f32 %v340_v16, 0.0 }
 0x136   :  { %v203_v20 = vpop.f32.mrf.mxu0 }
 0x137   :  { %v204_v21 = vadd.f32 %v994_v42, %v203_v20  ;;  %v424_v22 = vpack.c.bf16 %v400_v19, %v399_v17 }
 0x139   :  { %v237_v24 = vmax.f32 %v204_v21, 0.0  ;;  %517 = vmatmul.bf16.gmra.mxu2 %v424_v22 }
 0x13a   :  { %v342_v25 = vpop.f32.mrf.mxu1 }
 0x13b   :  { %v252_v26 = vpack.c.bf16 %v237_v24, %v236_v23  ;;  %v343_v28 = vadd.f32 %v1064_v61, %v342_v25 }
 0x13d   :  { %381 = vmatmul.bf16.vlgmr.msrb.gmra.mxu3 %v252_v26  ;;  %v401_v33 = vmax.f32 %v343_v28, 0.0  ;;  %v1096_v28 = vld [vmem:[%s1176_s6] ss:$0 sm:$0xff] }
 0x142   :  { %v344_v29 = vpop.f32.mrf.mxu1 }
 0x143   :  { %v345_v32 = vadd.f32 %v1064_v61, %v344_v29 }
 0x145   :  { %v402_v34 = vmax.f32 %v345_v32, 0.0 }
 0x147   :  { %v425_v38 = vpack.c.bf16 %v402_v34, %v401_v33 }
 0x149   :  { %522 = vmatmul.bf16.gmra.mxu2 %v425_v38 }
 0x14a   :  { %v347_v39 = vpop.f32.mrf.mxu1 }
 0x14b   :  { %v348_v43 = vadd.f32 %v1064_v61, %v347_v39 }
 0x14d   :  { %386 = vmatmul.bf16.gmra.mxu3 %v253_v40  ;;  %v403_v48 = vmax.f32 %v348_v43, 0.0 }
 0x152   :  { %v349_v44 = vpop.f32.mrf.mxu1 }
 0x153   :  { %v350_v47 = vadd.f32 %v1064_v61, %v349_v44 }
 0x155   :  { %v404_v49 = vmax.f32 %v350_v47, 0.0 }
 0x157   :  { %v426_v52 = vpack.c.bf16 %v404_v49, %v403_v48 }
 0x159   :  { %527 = vmatmul.bf16.gmra.mxu2 %v426_v52 }
 0x15a   :  { %v352_v53 = vpop.f32.mrf.mxu1 }
 0x15b   :  { %v353_v55 = vadd.f32 %v1064_v61, %v352_v53 }
 0x15d   :  { %391 = vmatmul.bf16.gmra.mxu3 %v254_v54  ;;  %v405_v58 = vmax.f32 %v353_v55, 0.0 }
 0x162   :  { %v354_v56 = vpop.f32.mrf.mxu1 }
 0x163   :  { %v355_v57 = vadd.f32 %v1064_v61, %v354_v56 }
 0x165   :  { %v406_v59 = vmax.f32 %v355_v57, 0.0 }
 0x167   :  { %v427_v60 = vpack.c.bf16 %v406_v59, %v405_v58 }
 0x169   :  { %532 = vmatmul.bf16.gmra.mxu2 %v427_v60 }
 0x16a   :  { %v357_v42 = vpop.f32.mrf.mxu1 }
 0x16b   :  { %v358_v62 = vadd.f32 %v1064_v61, %v357_v42 }
 0x16d   :  { %v407_v1 = vmax.f32 %v358_v62, 0.0 }
 0x172   :  { %v359_v63 = vpop.f32.mrf.mxu1 }
 0x173   :  { %v360_v0 = vadd.f32 %v1064_v61, %v359_v63 }
 0x175   :  { %v408_v2 = vmax.f32 %v360_v0, 0.0 }
 0x177   :  { %v428_v3 = vpack.c.bf16 %v408_v2, %v407_v1 }
 0x179   :  { %537 = vmatmul.bf16.gmra.mxu2 %v428_v3 }
 0x17a   :  { %v362_v4 = vpop.f32.mrf.mxu1 }
 0x17b   :  { %v363_v5 = vadd.f32 %v1064_v61, %v362_v4 }
 0x17d   :  { %v409_v8 = vmax.f32 %v363_v5, 0.0 }
 0x182   :  { %v364_v6 = vpop.f32.mrf.mxu1 }
 0x183   :  { %v365_v7 = vadd.f32 %v1064_v61, %v364_v6 }
 0x185   :  { %v410_v9 = vmax.f32 %v365_v7, 0.0 }
 0x187   :  { %v429_v10 = vpack.c.bf16 %v410_v9, %v409_v8 }
 0x189   :  { %542 = vmatmul.bf16.gmra.mxu2 %v429_v10 }
 0x18a   :  { %v367_v11 = vpop.f32.mrf.mxu1 }
 0x18b   :  { %v368_v12 = vadd.f32 %v1064_v61, %v367_v11 }
 0x18d   :  { %v411_v15 = vmax.f32 %v368_v12, 0.0 }
 0x192   :  { %v369_v13 = vpop.f32.mrf.mxu1 }
 0x193   :  { %v370_v14 = vadd.f32 %v1064_v61, %v369_v13 }
 0x195   :  { %v412_v16 = vmax.f32 %v370_v14, 0.0 }
 0x197   :  { %v430_v17 = vpack.c.bf16 %v412_v16, %v411_v15 }
 0x199   :  { %547 = vmatmul.bf16.gmra.mxu2 %v430_v17 }
 0x19a   :  { %v372_v18 = vpop.f32.mrf.mxu1 }
 0x19b   :  { %v373_v19 = vadd.f32 %v1064_v61, %v372_v18 }
 0x19d   :  { %v413_v22 = vmax.f32 %v373_v19, 0.0 }
 0x1a2   :  { %v374_v20 = vpop.f32.mrf.mxu1 }
 0x1a3   :  { %v375_v21 = vadd.f32 %v1064_v61, %v374_v20 }
 0x1a5   :  { %v414_v23 = vmax.f32 %v375_v21, 0.0 }
 0x1a7   :  { %v431_v24 = vpack.c.bf16 %v414_v23, %v413_v22 }
 0x1a9   :  { %552 = vmatmul.bf16.gmra.mxu2 %v431_v24 }
 0x1aa   :  { %v377_v25 = vpop.f32.mrf.mxu1 }
 0x1ab   :  { %v378_v27 = vadd.f32 %v1064_v61, %v377_v25 }
 0x1ac   :  { %v513_v26 = vpop.f32.mrf.mxu2 }
 0x1ad   :  { %v415_v32 = vmax.f32 %v378_v27, 0.0  ;;  %v514_v33 = vadd.f32 %v1096_v28, %v513_v26 }
 0x1b2   :  { %v379_v29 = vpop.f32.mrf.mxu1 }
 0x1b3   :  { %v380_v30 = vadd.f32 %v1064_v61, %v379_v29 }
 0x1b4   :  { %v515_v31 = vpop.f32.mrf.mxu2 }
 0x1b5   :  { %v416_v34 = vmax.f32 %v380_v30, 0.0  ;;  %v516_v35 = vadd.f32 %v1096_v28, %v515_v31 }
 0x1b7   :  { %v750_v36 = vpack.c.bf16 %v516_v35, %v514_v33  ;;  %v432_v37 = vpack.c.bf16 %v416_v34, %v415_v32 }
 0x1b9   :  { %751 = vst [vmem:[%s1177_s7] sm:$0xff] %v750_v36   ;;  %557 = vmatmul.bf16.gmra.mxu2 %v432_v37 }
 0x1bc   :  { %v518_v38 = vpop.f32.mrf.mxu2 }
 0x1bd   :  { %v519_v41 = vadd.f32 %v1096_v28, %v518_v38 }
 0x1c0   :  { %v382_v39 = vpop.f32.mrf.mxu3 }
 0x1c1   :  { %v383_v44 = vadd.f32 %v1064_v61, %v382_v39 }
 0x1c3   :  { %v417_v48 = vmax.f32 %v383_v44, 0.0 }
 0x1c4   :  { %v520_v40 = vpop.f32.mrf.mxu2 }
 0x1c5   :  { %v521_v43 = vadd.f32 %v1096_v28, %v520_v40 }
 0x1c7   :  { %v755_v45 = vpack.c.bf16 %v521_v43, %v519_v41 }
 0x1c8   :  { %v384_v46 = vpop.f32.mrf.mxu3 }
 0x1c9   :  { %812 = vst [vmem:[%s1177_s7 + $0x8] sm:$0xff] %v755_v45   ;;  %v385_v47 = vadd.f32 %v1064_v61, %v384_v46 }
 0x1cb   :  { %v418_v49 = vmax.f32 %v385_v47, 0.0 }
 0x1cc   :  { %v523_v50 = vpop.f32.mrf.mxu2 }
 0x1cd   :  { %v433_v51 = vpack.c.bf16 %v418_v49, %v417_v48  ;;  %v524_v54 = vadd.f32 %v1096_v28, %v523_v50 }
 0x1cf   :  { %562 = vmatmul.bf16.vlgmr.msra.gmra.mxu3 %v433_v51 }
 0x1d0   :  { %v387_v52 = vpop.f32.mrf.mxu3 }
 0x1d1   :  { %v388_v56 = vadd.f32 %v1064_v61, %v387_v52 }
 0x1d3   :  { %v419_v60 = vmax.f32 %v388_v56, 0.0 }
 0x1d4   :  { %v525_v53 = vpop.f32.mrf.mxu2 }
 0x1d5   :  { %v526_v55 = vadd.f32 %v1096_v28, %v525_v53 }
 0x1d7   :  { %v760_v57 = vpack.c.bf16 %v526_v55, %v524_v54 }
 0x1d8   :  { %v389_v58 = vpop.f32.mrf.mxu3 }
 0x1d9   :  { %813 = vst [vmem:[%s1177_s7 + $0x10] sm:$0xff] %v760_v57   ;;  %v390_v59 = vadd.f32 %v1064_v61, %v389_v58 }
 0x1db   :  { %v420_v42 = vmax.f32 %v390_v59, 0.0 }
 0x1dc   :  { %v528_v62 = vpop.f32.mrf.mxu2 }
 0x1dd   :  { %v434_v63 = vpack.c.bf16 %v420_v42, %v419_v60  ;;  %v529_v2 = vadd.f32 %v1096_v28, %v528_v62 }
 0x1df   :  { %567 = vmatmul.bf16.gmra.mxu3 %v434_v63 }
 0x1e0   :  { %v392_v0 = vpop.f32.mrf.mxu3 }
 0x1e1   :  { %v393_v4 = vadd.f32 %v1064_v61, %v392_v0 }
 0x1e3   :  { %v421_v8 = vmax.f32 %v393_v4, 0.0 }
 0x1e4   :  { %v530_v1 = vpop.f32.mrf.mxu2 }
 0x1e5   :  { %v531_v3 = vadd.f32 %v1096_v28, %v530_v1 }
 0x1e7   :  { %v765_v5 = vpack.c.bf16 %v531_v3, %v529_v2 }
 0x1e8   :  { %v394_v6 = vpop.f32.mrf.mxu3 }
 0x1e9   :  { %814 = vst [vmem:[%s1177_s7 + $0x18] sm:$0xff] %v765_v5   ;;  %v395_v7 = vadd.f32 %v1064_v61, %v394_v6 }
 0x1eb   :  { %v422_v9 = vmax.f32 %v395_v7, 0.0 }
 0x1ec   :  { %v533_v10 = vpop.f32.mrf.mxu2 }
 0x1ed   :  { %v435_v11 = vpack.c.bf16 %v422_v9, %v421_v8  ;;  %v534_v13 = vadd.f32 %v1096_v28, %v533_v10 }
 0x1ef   :  { %572 = vmatmul.bf16.gmra.mxu3 %v435_v11 }
 0x1f4   :  { %v535_v12 = vpop.f32.mrf.mxu2 }
 0x1f5   :  { %v536_v14 = vadd.f32 %v1096_v28, %v535_v12 }
 0x1f7   :  { %v770_v15 = vpack.c.bf16 %v536_v14, %v534_v13 }
 0x1f9   :  { %815 = vst [vmem:[%s1177_s7 + $0x20] sm:$0xff] %v770_v15  }
 0x1fc   :  { %v538_v16 = vpop.f32.mrf.mxu2 }
 0x1fd   :  { %v539_v18 = vadd.f32 %v1096_v28, %v538_v16 }
 0x204   :  { %v540_v17 = vpop.f32.mrf.mxu2 }
 0x205   :  { %v541_v61 = vadd.f32 %v1096_v28, %v540_v17 }
 0x207   :  { %v775_v19 = vpack.c.bf16 %v541_v61, %v539_v18 }
 0x209   :  { %816 = vst [vmem:[%s1177_s7 + $0x28] sm:$0xff] %v775_v19  }
 0x20c   :  { %v543_v20 = vpop.f32.mrf.mxu2 }
 0x20d   :  { %v544_v22 = vadd.f32 %v1096_v28, %v543_v20 }
 0x214   :  { %v545_v21 = vpop.f32.mrf.mxu2 }
 0x215   :  { %v546_v23 = vadd.f32 %v1096_v28, %v545_v21 }
 0x217   :  { %v780_v24 = vpack.c.bf16 %v546_v23, %v544_v22 }
 0x219   :  { %817 = vst [vmem:[%s1177_s7 + $0x30] sm:$0xff] %v780_v24  }
 0x21c   :  { %v548_v25 = vpop.f32.mrf.mxu2 }
 0x21d   :  { %v549_v27 = vadd.f32 %v1096_v28, %v548_v25 }
 0x224   :  { %v550_v26 = vpop.f32.mrf.mxu2 }
 0x225   :  { %v551_v29 = vadd.f32 %v1096_v28, %v550_v26 }
 0x227   :  { %v785_v30 = vpack.c.bf16 %v551_v29, %v549_v27 }
 0x229   :  { %818 = vst [vmem:[%s1177_s7 + $0x38] sm:$0xff] %v785_v30  }
 0x22c   :  { %v553_v31 = vpop.f32.mrf.mxu2 }
 0x22d   :  { %v554_v33 = vadd.f32 %v1096_v28, %v553_v31 }
 0x234   :  { %v555_v32 = vpop.f32.mrf.mxu2 }
 0x235   :  { %v556_v34 = vadd.f32 %v1096_v28, %v555_v32 }
 0x237   :  { %v790_v35 = vpack.c.bf16 %v556_v34, %v554_v33 }
 0x239   :  { %819 = vst [vmem:[%s1177_s7 + $0x40] sm:$0xff] %v790_v35  }
 0x23c   :  { %v558_v36 = vpop.f32.mrf.mxu2 }
 0x23d   :  { %v559_v38 = vadd.f32 %v1096_v28, %v558_v36 }
 0x244   :  { %v560_v37 = vpop.f32.mrf.mxu2 }
 0x245   :  { %v561_v39 = vadd.f32 %v1096_v28, %v560_v37 }
 0x247   :  { %v795_v40 = vpack.c.bf16 %v561_v39, %v559_v38 }
 0x249   :  { %820 = vst [vmem:[%s1177_s7 + $0x48] sm:$0xff] %v795_v40  }
 0x252   :  { %v563_v41 = vpop.f32.mrf.mxu3 }
 0x253   :  { %v564_v44 = vadd.f32 %v1096_v28, %v563_v41 }
 0x25a   :  { %v565_v43 = vpop.f32.mrf.mxu3 }
 0x25b   :  { %v566_v45 = vadd.f32 %v1096_v28, %v565_v43 }
 0x25d   :  { %v800_v46 = vpack.c.bf16 %v566_v45, %v564_v44 }
 0x25f   :  { %821 = vst [vmem:[%s1177_s7 + $0x50] sm:$0xff] %v800_v46  }
 0x262   :  { %v568_v47 = vpop.f32.mrf.mxu3 }
 0x263   :  { %v569_v49 = vadd.f32 %v1096_v28, %v568_v47 }
 0x26a   :  { %v570_v48 = vpop.f32.mrf.mxu3 }
 0x26b   :  { %v571_v50 = vadd.f32 %v1096_v28, %v570_v48 }
 0x26d   :  { %v805_v51 = vpack.c.bf16 %v571_v50, %v569_v49 }
 0x26f   :  { %822 = vst [vmem:[%s1177_s7 + $0x58] sm:$0xff] %v805_v51  }
 0x272   :  { %v573_v52 = vpop.f32.mrf.mxu3 }
 0x273   :  { %v574_v54 = vadd.f32 %v1096_v28, %v573_v52 }
 0x27a   :  { %v575_v53 = vpop.f32.mrf.mxu3 }
 0x27b   :  { %v576_v55 = vadd.f32 %v1096_v28, %v575_v53 }
 0x27d   :  { %v810_v56 = vpack.c.bf16 %v576_v55, %v574_v54 }
 0x27f   :  { %823 = vst [vmem:[%s1177_s7 + $0x60] sm:$0xff] %v810_v56  }

</bundles_post_ra>
